<compile_context>
chip_gen: v6e
topology: v6e:2x2x1
jax: 0.10.0
libtpu: 0.0.40
codegen_flags: <defaults>
</compile_context>

<pallas_src>
import jax
import jax.numpy as jnp
from jax.experimental import pallas as pl
from jax.experimental.pallas import tpu as pltpu


KERNEL_SIZE = 3        # fixed by the module (kernel_size=3, padding=1)
_TL_MAX = 8192         # max sequence tile per grid step
_MIN_GRID_STEPS = 8    # keep enough steps for megacore + pipeline overlap


def _conv1d_relu_kernel(xcol_ref, w_ref, b_ref, o_ref):
    # xcol_ref: (1, TL, 3*C_in)  im2col slab for one (batch, L-tile)
    # w_ref:    (3*C_in, H)      flattened conv weight (resident in VMEM)
    # b_ref:    (1, H)           bias (resident)
    # o_ref:    (1, TL, H)       output tile in the module's final layout
    acc = jnp.dot(xcol_ref[0], w_ref[...], preferred_element_type=jnp.float32)
    acc = acc + b_ref[...]                      # (1, H) broadcast over rows
    o_ref[0] = jnp.maximum(acc, 0.0).astype(o_ref.dtype)


def _choose_tile(B, L):
    """Pick the sequence tile: as large as possible but keep >= ~8 grid steps."""
    if L <= _TL_MAX:
        return L                                   # full-L block (exempt from 8/128 rule)
    steps_per_batch = max(1, pl.cdiv(_MIN_GRID_STEPS, B))
    tl = min(_TL_MAX, pl.cdiv(L, steps_per_batch))
    return pl.cdiv(tl, 8) * 8                      # sublane-aligned


def signal_representation_learning(x, weight, bias):
    """x: (B, L, C_in) float32; weight: (H, C_in, 3); bias: (H,).

    Returns (B, L, H) = relu(conv1d_k3_pad1 over the L axis), matching
    PyTorch: relu(Conv1d(x.transpose(1,2))).transpose(1,2).
    """
    B, L, C_in = x.shape
    H = weight.shape[0]
    K3C = KERNEL_SIZE * C_in

    # --- wrapper glue: zero halo pad + im2col on the LAST axis (no transpose) ---
    # x_col[b, l, t*C_in + c] = x_pad[b, l + t, c]
    x_halo = jnp.pad(x, ((0, 0), (1, 1), (0, 0)))                 # (B, L+2, C_in)
    x_col = jnp.concatenate(
        [x_halo[:, t:t + L, :] for t in range(KERNEL_SIZE)], axis=-1
    )                                                             # (B, L, 3*C_in)

    TL = _choose_tile(B, L)
    Lp = pl.cdiv(L, TL) * TL
    if Lp != L:
        x_col = jnp.pad(x_col, ((0, 0), (0, Lp - L), (0, 0)))

    # Flatten weight (H, C_in, 3) -> (3*C_in, H) matching x_col's tap-major order:
    # w_mat[t*C_in + c, h] = weight[h, c, t]
    w_mat = jnp.transpose(weight, (2, 1, 0)).reshape(K3C, H)
    b2d = bias.reshape(1, H)

    out = pl.pallas_call(
        _conv1d_relu_kernel,
        out_shape=jax.ShapeDtypeStruct((B, Lp, H), x.dtype),
        grid_spec=pltpu.PrefetchScalarGridSpec(
            num_scalar_prefetch=0,
            grid=(B, Lp // TL),
            in_specs=[
                pl.BlockSpec((1, TL, K3C), lambda b, l: (b, l, 0)),
                pl.BlockSpec((K3C, H), lambda b, l: (0, 0)),
                pl.BlockSpec((1, H), lambda b, l: (0, 0)),
            ],
            out_specs=pl.BlockSpec((1, TL, H), lambda b, l: (b, l, 0)),
        ),
        compiler_params=pltpu.CompilerParams(
            dimension_semantics=("parallel", "parallel"),
            vmem_limit_bytes=32 * 1024 * 1024,
        ),
    )(x_col, w_mat, b2d)

    # Drop the L padding tail (it only holds relu(bias)); already (B, L, H).
    if Lp != L:
        out = out[:, :L, :]
    return out


def _reference(x, weight, bias):
    """Pure-JAX reference matching the PyTorch module semantics."""
    x_ncw = jnp.transpose(x, (0, 2, 1))          # (B, C_in, L)
    y = jax.lax.conv_general_dilated(
        x_ncw, weight,                           # weight: (H, C_in, 3) == OIW
        window_strides=(1,),
        padding=((1, 1),),
        dimension_numbers=("NCW", "OIW", "NCW"),
    )
    y = y + bias.reshape(1, -1, 1)
    y = jnp.maximum(y, 0.0)
    return jnp.transpose(y, (0, 2, 1))           # back to (B, L, H)


if __name__ == "__main__":
    batch = 2
    seq_len = 16
    input_size = 4     # C_in
    hidden_size = 32   # H

    key = jax.random.PRNGKey(0)
    k_x, k_w, k_b = jax.random.split(key, 3)

    x = jax.random.normal(k_x, (batch, seq_len, input_size), dtype=jnp.float32)
    weight = 0.1 * jax.random.normal(
        k_w, (hidden_size, input_size, KERNEL_SIZE), dtype=jnp.float32)
    bias = 0.1 * jax.random.normal(k_b, (hidden_size,), dtype=jnp.float32)

    out = signal_representation_learning(x, weight, bias)
    out = jax.block_until_ready(out)

    ref = jax.block_until_ready(_reference(x, weight, bias))
    assert out.shape == (batch, seq_len, hidden_size)
    assert jnp.allclose(out, ref, atol=1e-5, rtol=1e-5), "mismatch vs reference"

    print("KERNEL_OK")
</pallas_src>

<mosaic_0001>
module attributes {stable_mosaic.version = 11 : i64} {
  func.func @_conv1d_relu_kernel(%arg0: i32, %arg1: i32, %arg2: memref<1x16x12xf32, #tpu.memory_space<vmem>>, %arg3: memref<12x32xf32, #tpu.memory_space<vmem>>, %arg4: memref<1x32xf32, #tpu.memory_space<vmem>>, %arg5: memref<1x16x32xf32, #tpu.memory_space<vmem>>) attributes {dimension_semantics = [#tpu.dimension_semantics<parallel>, #tpu.dimension_semantics<parallel>], iteration_bounds = array<i64: 2, 1>, scalar_prefetch = 0 : i64, scratch_operands = 0 : i64, tpu.core_type = #tpu.core_type<tc>, window_params = [{transform_indices = @transform_0, window_bounds = array<i64: 1, 16, 12>}, {pipeline_mode = #tpu.pipeline_mode<synchronous>, transform_indices = @transform_1, window_bounds = array<i64: 12, 32>}, {pipeline_mode = #tpu.pipeline_mode<synchronous>, transform_indices = @transform_2, window_bounds = array<i64: 1, 32>}, {transform_indices = @transform_3, window_bounds = array<i64: 1, 16, 32>}]} {
    %c0 = arith.constant 0 : index
    %c0_0 = arith.constant 0 : index
    %c0_1 = arith.constant 0 : index
    %0 = vector.load %arg2[%c0, %c0_0, %c0_1] : memref<1x16x12xf32, #tpu.memory_space<vmem>>, vector<1x16x12xf32>
    %1 = vector.shape_cast %0 : vector<1x16x12xf32> to vector<16x12xf32>
    %c0_2 = arith.constant 0 : index
    %c0_3 = arith.constant 0 : index
    %2 = vector.load %arg3[%c0_2, %c0_3] : memref<12x32xf32, #tpu.memory_space<vmem>>, vector<12x32xf32>
    %cst = arith.constant dense<0.000000e+00> : vector<16x32xf32>
    %3 = tpu.matmul %1, %2, %cst {dimension_numbers = #tpu.dot_dimension_numbers<[1], [0], [0], [1], [0, 0, 1, 1], [], []>} : vector<16x12xf32>, vector<12x32xf32>, vector<16x32xf32> -> vector<16x32xf32>
    %c0_4 = arith.constant 0 : index
    %c0_5 = arith.constant 0 : index
    %4 = vector.load %arg4[%c0_4, %c0_5] : memref<1x32xf32, #tpu.memory_space<vmem>>, vector<1x32xf32>
    %5 = vector.broadcast %4 : vector<1x32xf32> to vector<16x32xf32>
    %6 = arith.addf %3, %5 : vector<16x32xf32>
    %cst_6 = arith.constant 0.000000e+00 : f32
    %7 = vector.broadcast %cst_6 : f32 to vector<16x32xf32>
    %8 = arith.maximumf %6, %7 : vector<16x32xf32>
    %c0_7 = arith.constant 0 : index
    %c0_8 = arith.constant 0 : index
    %c0_9 = arith.constant 0 : index
    %9 = vector.load %arg5[%c0_7, %c0_8, %c0_9] : memref<1x16x32xf32, #tpu.memory_space<vmem>>, vector<1x16x32xf32>
    %10 = vector.shape_cast %9 : vector<1x16x32xf32> to vector<16x32xf32>
    %11 = vector.shape_cast %8 : vector<16x32xf32> to vector<1x16x32xf32>
    tpu.vector_store %arg5[%c0_7, %c0_8, %c0_9], %11 {strides = array<i32>} : memref<1x16x32xf32, #tpu.memory_space<vmem>>, vector<1x16x32xf32>,
    return
  }
  func.func @transform_0(%arg0: i32, %arg1: i32) -> (i32, i32, i32) {
    %c0_i32 = arith.constant 0 : i32
    %c0_i32_0 = arith.constant 0 : i32
    return %arg0, %arg1, %c0_i32 : i32, i32, i32
  }
  func.func @transform_1(%arg0: i32, %arg1: i32) -> (i32, i32) {
    %c0_i32 = arith.constant 0 : i32
    %c0_i32_0 = arith.constant 0 : i32
    %c0_i32_1 = arith.constant 0 : i32
    return %c0_i32, %c0_i32_0 : i32, i32
  }
  func.func @transform_2(%arg0: i32, %arg1: i32) -> (i32, i32) {
    %c0_i32 = arith.constant 0 : i32
    %c0_i32_0 = arith.constant 0 : i32
    %c0_i32_1 = arith.constant 0 : i32
    return %c0_i32, %c0_i32_0 : i32, i32
  }
  func.func @transform_3(%arg0: i32, %arg1: i32) -> (i32, i32, i32) {
    %c0_i32 = arith.constant 0 : i32
    %c0_i32_0 = arith.constant 0 : i32
    return %arg0, %arg1, %c0_i32 : i32, i32, i32
  }
}

</mosaic_0001>

<bundles_post_ra>
// kernel: tpu_custom_call.1
= control target key start
LH: loop header
LB: loop body
LE: loop exit
PB: predicated region body
PF: predicated region fallthrough
CT: control target
= control target key end

     0   :  { %8 = vsyncpa [#allocation3], 0  ;;  %s708_s0 = inlined_call_operand.vmem [shape: f32[2,16,12], index: 0, kind: input, shape index: {}]   ;;  %s709_s1 = inlined_call_operand.vmem [shape: f32[12,32], index: 1, kind: input, shape index: {}]   ;;  %s710_s2 = inlined_call_operand.vmem [shape: f32[1,32], index: 2, kind: input, shape index: {}]   ;;  %s711_s3 = inlined_call_operand.hbm [shape: f32[2,16,32], index: 3, kind: output, shape index: {}]  }
   0x1   :  { %10 = vsyncpa [#allocation3 + $0x1], 0  ;;  %s585_s12 = smov 0   ;;  %s587_s13 = smov 0  }
   0x2   :  { %s589_s14 = smov 0   ;;  %s591_s15 = smov 0  }
   0x3   :  { %s593_s16 = smov 0   ;;  %s595_s17 = smov 0  }
   0x4 LB: > { %s397_s18 = sadd.s32 4294967295, %s560_s17   ;;  %s398_s19 = sadd.s32 4294967294, %s560_s17   ;;  %s560_s17 = sphi %s595_s17, %s16_s17   ;;  %s556_s16 = sphi %s593_s16, %s718_s16   ;;  %s552_s15 = sphi %s591_s15, %s717_s15   ;;  %s548_s14 = sphi %s589_s14, %s716_s14   ;;  %s544_s13 = sphi %s587_s13, %s715_s13   ;;  %s540_s12 = sphi %s585_s12, %s714_s12  }
   0x5   : > { %s28_s20 = sadd.s32 1, %s556_s16  ;;  %s107_s21 = sadd.s32 1, %s548_s14 }
   0x6   : > { %p30_p0 = scmp.ge.s32.totalorder %s28_s20, 2  ;;  %p117_p1 = scmp.ne.s32.totalorder %s548_s14, %s544_s13 }
   0x7   : > { %p118_p2 = scmp.eq.s32.totalorder %s397_s18, 1  ;;  %p123_p3 = scmp.ne.s32.totalorder %s544_s13, %s540_s12 }
   0x8   : > { %s720_s20 = smov (%p30_p0, %s28_s20), 0  ;;  %p124_p5 = scmp.eq.s32.totalorder %s398_s19, 1 }
   0x9   : > { %p625_p4 = por %p118_p2, %p117_p1  ;;  %s102_s23 = ssub.s32 %s556_s16, %s720_s20 }
   0xa   : > { %p401_p6 = scmp.ge.s32.totalorder %s560_s17, 1  ;;  %p105_p7 = scmp.eq.s32.totalorder %s102_s23, 0 }
   0xb   : > { %p632_p8 = por %p124_p5, %p123_p3  ;;  %p161_p9 = scmp.lt.s32.totalorder %s560_s17, 3 }
   0xc   : > { %s638_s25 = scalar_select %p105_p7, %s548_s14, %s107_s21  }
   0xd   : > { %p162_p10 = pnand %p401_p6, %p161_p9 }
   0xe   : > { %p190_p11 = scmp.lt.s32.totalorder (!%p162_p10), %s552_s15, 1  ;;  %s186_s8 = sand.u32 (!%p162_p10), 1, %s544_s13  }
   0xf   : > { %165 = sbr.rel (%p162_p10) target bundleno = 239 (0xef), region = 32  ;;  %s402_s9 = sshll.u32 (!%p162_p10), %s186_s8, 4 }
  0x10   : > { %s188_s18 = scalar_lea.vmem (!%p162_p10), [#allocation2], %s402_s9  ;;  %s415_s21 = sshll.u32 (!%p162_p10), %s552_s15, 8 }
  0x11   : > { %s318_s19 = sshll.u32 (!%p162_p10), %s188_s18, 4  ;;  %s661_s27 = scalar_lea.hbm (!%p162_p10), %s711_s3, %s415_s21  ;;  %s656_s19 = int_to_ptr.vmem [resolvable:$true] %s318_s19 }
  0x12   : > { %s663_s28 = scalar_lea.sflag (!%p162_p10), [#allocation3], %s186_s8  ;;  %s562_s29 = smov (!%p162_p10), [#allocation2]  }
  0x14   : > { %v203_v0 = vld [vmem:[%s709_s1 + $0x8] sm:$0xf]  ;;  %vm218_vm0 = vcmask 1043456   ;;  %v202_v1 = vld [vmem:[%s709_s1] sm:$0xff]  ;;  %s191_s30 = scalar_select %p190_p11, %s552_s15, 1  ;;  %vm211_vm1 = vcmask 97280  }
  0x15   : > { %420 = vmatprep.subr.msk.mxu0 %vm218_vm0, %v203_v0  ;;  %v405_v4 = vld [vmem:[%s710_s2] ss:$0 sm:$0xff]  ;;  %vm299_vm2 = vcmask 261120   ;;  %s484_s15 = scalar_lea.vmem %s656_s19, 256 }
  0x16   : > { %421 = vmatpush3.msk.msra.mxu0 %vm218_vm0, %v203_v0  ;;  %s414_s4 = sshll.u32 %s191_s30, 4  ;;  %p485_p12 = scmp.ne.s32.totalorder %s656_s19, %s484_s15 }
  0x17   : > { %422 = vmatprep.subr.mxu0 %v202_v1  ;;  %s197_s7 = scalar_lea.vmem %s708_s0, %s414_s4  ;;  %s488_s30 = sshll.u32 %s562_s29, 4  ;;  %s489_s30 = int_to_ptr.vmem [resolvable:$false] %s488_s30 }
  0x18   : > { %423 = vmatpush3.msra.mxu0 %v202_v1  ;;  %v200_v2 = vld [vmem:[%s197_s7] sm:$0xff]  ;;  %v201_v3 = vld [vmem:[%s197_s7 + $0x8] sm:$0xff]  ;;  %p486_p13 = pnand %p485_p12, %p625_p4  ;;  %s490_s4 = scalar_lea.vmem %s489_s30, 512 }
  0x19   : > { %424 = vmatprep.mubr.msk.f32.mxu0 %vm211_vm1, %v200_v2  ;;  %p491_p1 = scmp.lt.s32.totalorder %s656_s19, %s489_s30  ;;  %p492_p2 = scmp.lt.s32.totalorder %s490_s4, %s484_s15 }
  0x1a   : > { %425 = vmatmul.mubr.msk.f32.vlgmr.msra.gmra.mxu0 %vm211_vm1, %v201_v3  ;;  %p487_p0 = pneg %p486_p13 }
  0x1b   : > { %p493_p3 = por %p492_p2, %p491_p1 }
  0x1d   : > { %p494_p5 = pnand %p493_p3, %p487_p0 }
  0xda   : > { %v426_v5 = vpop.f32.mrf.mxu0 }
  0xdb   : > { %v294_v6 = vadd.f32 %v426_v5, %v405_v4 }
  0xdc   : > { %v288_v7 = vpop.f32.mrf.mxu0 }
  0xdd   : > { %v298_v8 = vmax.f32 %v294_v6, 0.0  ;;  %v289_v9 = vadd.f32 %v405_v4, %v288_v7 }
  0xdf   : > { %301 = vst.msk [vmem:[%s188_s18 + $0x8] sm:$0xff] %vm299_vm2, %v298_v8  ;;  %v297_v10 = vmax.f32 %v289_v9, 0.0 }
  0xe1   : > { %300 = vst.msk [vmem:[%s188_s18] sm:$0xff] %vm299_vm2, %v297_v10 }
  0xe2   : > { %497 = shalt.err (!%p494_p5)
}
  0xe3   : > { %s498_s5 = scalar_lea.hbm %s661_s27, 256  ;;  %s502_s8 = scalar_lea.hbm %s711_s3, 512 }
  0xe4   : > { %p499_p6 = scmp.ne.s32.totalorder %s661_s27, %s498_s5  ;;  %p503_p10 = scmp.lt.s32.totalorder %s661_s27, %s711_s3 }
  0xe5   : > { %p504_p11 = scmp.lt.s32.totalorder %s502_s8, %s498_s5 }
  0xe6   : > { %p500_p7 = pnand %p499_p6, %p625_p4 }
  0xe7   : > { %p505_p12 = por %p504_p11, %p503_p10 }
  0xe8   : > { %p501_p9 = pneg %p500_p7 }
  0xea   : > { %p506_p13 = pnand %p505_p12, %p501_p9 }
  0xec   : > { %509 = shalt.err (!%p506_p13)
}
  0xed   : > { %s563_s11 = smov 128   ;;  %s564_s18 = smov 8  }
  0xee   : > { %427 = dma.vmem_to_hbm [thread:$0]  (%p625_p4), %s656_s19, 256, %s661_s27, %s663_s28, %s563_s11, %s563_s11, %s564_s18  }
  0xef PF: > { %p433_p0 = scmp.ge.s32.totalorder %s560_s17, 2  ;;  %s333_s21 = sand.u32 1, %s540_s12  }
  0xf0   : > { %s334_s23 = scalar_lea.sflag [#allocation3], %s333_s21 }
  0xf1   : > { %p430_p1 = pnand %p433_p0, %p632_p8 }
  0xf3   : > { %p431_p2 = pneg %p430_p1 }
  0xf5   : > { %535 = dma.done.wait (%p431_p2), %s334_s23, 256  }
  0xf6   : > { %537 = vsyncadd (%p431_p2), %s334_s23, 4294967040  ;;  %s16_s17 = sadd.s32 1, %s560_s17   ;;  %s714_s12 = smov %s544_s13 }
  0xf7   : > { %p13_p3 = scmp.ge.s32.totalorder %s16_s17, 4   ;;  %s715_s13 = smov %s548_s14 }
  0xf8   : > { %s716_s14 = smov %s638_s25  ;;  %s717_s15 = smov %s556_s16 }
  0xf9   : > { %s718_s16 = smov %s720_s20  ;;  %15 = sbr.rel (!%p13_p3) target bundleno = 4 (0x4), region = 67 }
  0xfe   :  { %339 = vsyncpa [#allocation3], 1 }
  0xff   :  { %341 = vsyncpa [#allocation3 + $0x1], 1 }

</bundles_post_ra>
